<compile_context>
chip_gen: v5e
topology: v5e:2x2
jax: 0.10.0
libtpu: 0.0.40
codegen_flags: <defaults>
</compile_context>

<pallas_src>
import jax
import jax.numpy as jnp
from jax import lax
from jax.experimental import pallas as pl
from jax.experimental.pallas import tpu as pltpu


def _round_up(x, m):
    return ((x + m - 1) // m) * m


def _weighted_ce_kernel(x_ref, tgt_ref, wrow_ref, acc_ref):
    """One (TILE_N, C_pad) row tile of the weighted-CE reduction.

    acc_ref: SMEM (2,) f32 output, resident across the grid: [numerator, denominator].
    """
    step = pl.program_id(0)

    @pl.when(step == 0)
    def _init():
        acc_ref[0] = jnp.float32(0.0)
        acc_ref[1] = jnp.float32(0.0)

    logits = x_ref[...].astype(jnp.float32)        # (TILE_N, C_pad)
    tgt = tgt_ref[...]                             # (TILE_N, 1) int32
    wr = wrow_ref[...].astype(jnp.float32)         # (TILE_N, 1) = weight[target_i]

    n, c = logits.shape

    # Numerically stable logsumexp along the class (lane) axis.
    m = jnp.max(logits, axis=-1, keepdims=True)                         # (TILE_N, 1)
    shifted = logits - m
    lse = jnp.log(jnp.sum(jnp.exp(shifted), axis=-1, keepdims=True))    # (TILE_N, 1)

    # Fused one-hot gather of shifted[target_i]: masked lane reduce, no
    # materialized one-hot and no full logp tensor.
    cls_idx = lax.broadcasted_iota(jnp.int32, (n, c), 1)
    tgt_shifted = jnp.sum(jnp.where(cls_idx == tgt, shifted, 0.0),
                          axis=-1, keepdims=True)                        # (TILE_N, 1)

    per_row_nll = lse - tgt_shifted               # = -log_softmax(x)[target]

    acc_ref[0] += jnp.sum(wr * per_row_nll)       # weighted NLL partial
    acc_ref[1] += jnp.sum(wr)                     # weight-sum partial


def weighted_cross_entropy(logits, targets, weight, *, tile_n=None):
    """logits: (N, C) float, targets: (N,) int, weight: (C,) float -> scalar f32 loss."""
    n, c = logits.shape
    targets = targets.astype(jnp.int32)

    # Gather per-row class weight outside the (N, C) hot loop.
    w_rows = weight.astype(jnp.float32)[targets]                        # (N,)

    # Pad classes up to a lane multiple so every vector op is full-width.
    c_pad = _round_up(max(c, 128), 128)
    itemsize = jnp.dtype(logits.dtype).itemsize

    # Largest row tile that keeps the double-buffered logits tile well inside
    # scoped VMEM (~4 MiB per buffer -> 8 MiB pipelined, plus f32 temporaries).
    if tile_n is None:
        budget_bytes = 4 * 1024 * 1024
        tile_n = min(1024, max(8, budget_bytes // (c_pad * itemsize)))
    tile_n = min(int(tile_n), _round_up(n, 8))
    tile_n = max(8, (tile_n // 8) * 8)

    n_pad = _round_up(n, tile_n)
    n_tiles = n_pad // tile_n

    # Pad rows/classes. Padded classes get a hugely negative logit (exp -> 0);
    # padded rows get weight 0 so they contribute nothing to num/den.
    neg = jnp.asarray(jnp.finfo(logits.dtype).min / 2, dtype=logits.dtype)
    x = jnp.full((n_pad, c_pad), neg, dtype=logits.dtype).at[:n, :c].set(logits)
    tgt2d = jnp.zeros((n_pad, 1), jnp.int32).at[:n, 0].set(targets)
    w2d = jnp.zeros((n_pad, 1), jnp.float32).at[:n, 0].set(w_rows)

    num_den = pl.pallas_call(
        _weighted_ce_kernel,
        out_shape=jax.ShapeDtypeStruct((2,), jnp.float32),
        grid_spec=pltpu.PrefetchScalarGridSpec(
            num_scalar_prefetch=0,
            grid=(n_tiles,),
            in_specs=[
                pl.BlockSpec((tile_n, c_pad), lambda i: (i, 0)),
                pl.BlockSpec((tile_n, 1), lambda i: (i, 0)),
                pl.BlockSpec((tile_n, 1), lambda i: (i, 0)),
            ],
            # Scalar accumulator lives in SMEM, resident across all grid steps,
            # written back to HBM once at the end (no per-step masked vst).
            out_specs=pl.BlockSpec(memory_space=pltpu.MemorySpace.SMEM),
        ),
        compiler_params=pltpu.CompilerParams(
            # Running num/den accumulator across row tiles -> reduction axis.
            dimension_semantics=("arbitrary",),
            vmem_limit_bytes=32 * 1024 * 1024,
        ),
    )(x, tgt2d, w2d)

    # Final divide once, outside the kernel (matches PyTorch: den==0 -> NaN).
    return num_den[0] / num_den[1]


class CrossEntropyLossWithWeights:
    """Mirror of the PyTorch module: holds the class-weight vector."""

    def __init__(self, weight):
        self.weight = jnp.asarray(weight)

    def __call__(self, input, target):
        return weighted_cross_entropy(input, target, self.weight)


if __name__ == "__main__":
    key = jax.random.PRNGKey(0)
    k_x, k_t, k_w, k_x2, k_t2 = jax.random.split(key, 5)

    def ref_loss(lg, tg, w):
        logp = jax.nn.log_softmax(lg.astype(jnp.float32), axis=-1)
        nll = -jnp.take_along_axis(logp, tg[:, None], axis=-1)[:, 0]
        wr = w[tg]
        return jnp.sum(wr * nll) / jnp.sum(wr)

    # Four-class MLP classification head: small batch, C = 4.
    N, C = 8, 4
    logits = jax.random.normal(k_x, (N, C), dtype=jnp.float32)
    targets = jax.random.randint(k_t, (N,), 0, C, dtype=jnp.int32)
    weight = jax.random.uniform(k_w, (C,), dtype=jnp.float32, minval=0.5, maxval=2.0)

    loss_fn = CrossEntropyLossWithWeights(weight)
    loss = loss_fn(logits, targets)
    jax.block_until_ready(loss)

    ref = ref_loss(logits, targets, weight)
    assert jnp.allclose(loss, ref, rtol=1e-5, atol=1e-5), (loss, ref)

    # Exercise the multi-tile grid + row-padding accumulation path.
    N2 = 300
    logits2 = jax.random.normal(k_x2, (N2, C), dtype=jnp.float32)
    targets2 = jax.random.randint(k_t2, (N2,), 0, C, dtype=jnp.int32)
    loss2 = weighted_cross_entropy(logits2, targets2, weight, tile_n=128)
    jax.block_until_ready(loss2)
    ref2 = ref_loss(logits2, targets2, weight)
    assert jnp.allclose(loss2, ref2, rtol=1e-5, atol=1e-5), (loss2, ref2)

    print("KERNEL_OK")
</pallas_src>

<mosaic_0001>
module attributes {stable_mosaic.version = 11 : i64} {
  func.func @_weighted_ce_kernel(%arg0: i32, %arg1: memref<8x128xf32, #tpu.memory_space<vmem>>, %arg2: memref<8x1xi32, #tpu.memory_space<vmem>>, %arg3: memref<8x1xf32, #tpu.memory_space<vmem>>, %arg4: memref<2xf32, #tpu.memory_space<smem>>) attributes {dimension_semantics = [#tpu.dimension_semantics<arbitrary>], iteration_bounds = array<i64: 1>, scalar_prefetch = 0 : i64, scratch_operands = 0 : i64, tpu.core_type = #tpu.core_type<tc>, window_params = [{transform_indices = @transform_0, window_bounds = array<i64: 8, 128>}, {transform_indices = @transform_1, window_bounds = array<i64: 8, 1>}, {transform_indices = @transform_2, window_bounds = array<i64: 8, 1>}, {transform_indices = @transform_3, window_bounds = array<i64: 2>}]} {
    %c0_i32 = arith.constant 0 : i32
    %0 = arith.cmpi eq, %arg0, %c0_i32 : i32
    %1 = arith.extui %0 : i1 to i32
    %c0_i32_0 = arith.constant 0 : i32
    %2 = arith.cmpi ne, %1, %c0_i32_0 : i32
    scf.if %2 {
      %cst_14 = arith.constant 0.000000e+00 : f32
      %c0_15 = arith.constant 0 : index
      %37 = memref.load %arg4[%c0_15] : memref<2xf32, #tpu.memory_space<smem>>
      memref.store %cst_14, %arg4[%c0_15] : memref<2xf32, #tpu.memory_space<smem>>
      %cst_16 = arith.constant 0.000000e+00 : f32
      %c1_17 = arith.constant 1 : index
      %38 = memref.load %arg4[%c1_17] : memref<2xf32, #tpu.memory_space<smem>>
      memref.store %cst_16, %arg4[%c1_17] : memref<2xf32, #tpu.memory_space<smem>>
    } else {
    }
    %c0 = arith.constant 0 : index
    %c0_1 = arith.constant 0 : index
    %3 = vector.load %arg1[%c0, %c0_1] : memref<8x128xf32, #tpu.memory_space<vmem>>, vector<8x128xf32>
    %c0_2 = arith.constant 0 : index
    %c0_3 = arith.constant 0 : index
    %4 = vector.load %arg2[%c0_2, %c0_3] : memref<8x1xi32, #tpu.memory_space<vmem>>, vector<8x1xi32>
    %c0_4 = arith.constant 0 : index
    %c0_5 = arith.constant 0 : index
    %5 = vector.load %arg3[%c0_4, %c0_5] : memref<8x1xf32, #tpu.memory_space<vmem>>, vector<8x1xf32>
    %cst = arith.constant dense<0xFF800000> : vector<8xf32>
    %6 = vector.multi_reduction <maximumf>, %3, %cst [1] : vector<8x128xf32> to vector<8xf32>
    %7 = vector.shape_cast %6 : vector<8xf32> to vector<8x1xf32>
    %8 = vector.broadcast %7 : vector<8x1xf32> to vector<8x128xf32>
    %9 = arith.subf %3, %8 : vector<8x128xf32>
    %10 = math.exp %9 : vector<8x128xf32>
    %cst_6 = arith.constant dense<0.000000e+00> : vector<8xf32>
    %11 = vector.multi_reduction <add>, %10, %cst_6 [1] : vector<8x128xf32> to vector<8xf32>
    %12 = vector.shape_cast %11 : vector<8xf32> to vector<8x1xf32>
    %13 = math.log %12 : vector<8x1xf32>
    %14 = tpu.iota {dimensions = array<i32: 1>} : vector<8x128xi32>
    %15 = vector.broadcast %4 : vector<8x1xi32> to vector<8x128xi32>
    %16 = arith.cmpi eq, %14, %15 : vector<8x128xi32>
    %cst_7 = arith.constant 0.000000e+00 : f32
    %17 = vector.broadcast %cst_7 : f32 to vector<8x128xf32>
    %18 = arith.select %16, %9, %17 : vector<8x128xi1>, vector<8x128xf32>
    %cst_8 = arith.constant dense<0.000000e+00> : vector<8xf32>
    %19 = vector.multi_reduction <add>, %18, %cst_8 [1] : vector<8x128xf32> to vector<8xf32>
    %20 = vector.shape_cast %19 : vector<8xf32> to vector<8x1xf32>
    %21 = arith.subf %13, %20 : vector<8x1xf32>
    %c0_9 = arith.constant 0 : index
    %22 = memref.load %arg4[%c0_9] : memref<2xf32, #tpu.memory_space<smem>>
    %23 = arith.mulf %5, %21 : vector<8x1xf32>
    %24 = vector.shape_cast %23 : vector<8x1xf32> to vector<1x8x1xf32>
    %cst_10 = arith.constant dense<0.000000e+00> : vector<1xf32>
    %25 = vector.multi_reduction <add>, %24, %cst_10 [1, 2] : vector<1x8x1xf32> to vector<1xf32>
    %26 = vector.shape_cast %25 : vector<1xf32> to vector<1x1x1xf32>
    %27 = vector.extract %26[0, 0, 0] : f32 from vector<1x1x1xf32>
    %28 = arith.addf %22, %27 : f32
    %c0_11 = arith.constant 0 : index
    %29 = memref.load %arg4[%c0_11] : memref<2xf32, #tpu.memory_space<smem>>
    memref.store %28, %arg4[%c0_11] : memref<2xf32, #tpu.memory_space<smem>>
    %c1 = arith.constant 1 : index
    %30 = memref.load %arg4[%c1] : memref<2xf32, #tpu.memory_space<smem>>
    %31 = vector.shape_cast %5 : vector<8x1xf32> to vector<1x8x1xf32>
    %cst_12 = arith.constant dense<0.000000e+00> : vector<1xf32>
    %32 = vector.multi_reduction <add>, %31, %cst_12 [1, 2] : vector<1x8x1xf32> to vector<1xf32>
    %33 = vector.shape_cast %32 : vector<1xf32> to vector<1x1x1xf32>
    %34 = vector.extract %33[0, 0, 0] : f32 from vector<1x1x1xf32>
    %35 = arith.addf %30, %34 : f32
    %c1_13 = arith.constant 1 : index
    %36 = memref.load %arg4[%c1_13] : memref<2xf32, #tpu.memory_space<smem>>
    memref.store %35, %arg4[%c1_13] : memref<2xf32, #tpu.memory_space<smem>>
    return
  }
  func.func @transform_0(%arg0: i32) -> (i32, i32) {
    %c0_i32 = arith.constant 0 : i32
    %c0_i32_0 = arith.constant 0 : i32
    return %arg0, %c0_i32 : i32, i32
  }
  func.func @transform_1(%arg0: i32) -> (i32, i32) {
    %c0_i32 = arith.constant 0 : i32
    %c0_i32_0 = arith.constant 0 : i32
    return %arg0, %c0_i32 : i32, i32
  }
  func.func @transform_2(%arg0: i32) -> (i32, i32) {
    %c0_i32 = arith.constant 0 : i32
    %c0_i32_0 = arith.constant 0 : i32
    return %arg0, %c0_i32 : i32, i32
  }
  func.func @transform_3(%arg0: i32) -> i32 {
    %c0_i32 = arith.constant 0 : i32
    %c0_i32_0 = arith.constant 0 : i32
    return %c0_i32 : i32
  }
}

</mosaic_0001>

<bundles_post_ra>
// kernel: tpu_custom_call.1
= control target key start
LH: loop header
LB: loop body
LE: loop exit
PB: predicated region body
PF: predicated region fallthrough
CT: control target
= control target key end

     0   :  { %s151_s0 = inlined_call_operand.vmem [shape: f32[8,128], index: 0, kind: input, shape index: {}]   ;;  %s152_s1 = inlined_call_operand.vmem [shape: s32[8,1], index: 1, kind: input, shape index: {}]   ;;  %s153_s2 = inlined_call_operand.vmem [shape: f32[8,1], index: 2, kind: input, shape index: {}]   ;;  %s154_s3 = inlined_call_operand.hbm [shape: f32[2], index: 3, kind: output, shape index: {}]  }
   0x1   :  { %v23_v0 = vld [vmem:[%s151_s0] sm:$0xff] }
   0x2   :  { %8 = vsyncpa [#allocation3], 0  ;;  %26 = vmax.xlane.f32.xlu0 %v23_v0  ;;  %v117_v1 = vmov 0   ;;  %v24_v2 = vld [vmem:[%s152_s1] sm:$0xff]  ;;  %v35_v7 = vlaneseq  ;;  %vm47_vm1 = vcmask 7168   ;;  %s80_s18 = sshll.u32 %s154_s3, 4  ;;  %s81_s18 = int_to_ptr.hbm [resolvable:$true] %s80_s18 }
   0x3   :  { %98 = vset.pattern.permute.xlu0 %v117_v1  ;;  %v25_v15 = vld [vmem:[%s153_s2] sm:$0xff]  ;;  %s118_s20 = smov [#allocation2]  }
   0x4   :  { %v36_v8 = vand.u32 127, %v35_v7  ;;  %v62_v19 = vsel %vm47_vm1, %v25_v15, 0.0 }
  0x16   :  { %38 = vperm.xlu0 %98, %v24_v2  }
  0x75   :  { %v27_v3 = vpop.xlane.xlu0 %26 }
  0x76   :  { %v28_v4 = vsub.f32 %v23_v0, %v27_v3 }
  0x78   :  { %v29_v5 = vmul.f32 1.442695, %v28_v4 }
  0x7a   :  { %99 = vpow2.f32 %v29_v5 }
  0x80   :  { %v100_v6 = vpop.eup %99 }
  0x81   :  { %31 = vadd.xlane.f32.xlu1 %v100_v6 }
  0x88   :  { %v39_v9 = vpop.permute.xlu0 %38 }
  0x89   :  { %vm40_vm0 = vcmp.eq.s32.totalorder %v36_v8, %v39_v9 }
  0x8a   :  { %v41_v10 = vsel %vm40_vm0, %v28_v4, 0.0 }
  0x8b   :  { %42 = vadd.xlane.f32.xlu1 %v41_v10 }
  0xf4   :  { %v32_v11 = vpop.xlane.xlu1 %31 }
  0xf5   :  { %101 = vlog2.f32 %v32_v11 }
  0xfb   :  { %v102_v12 = vpop.eup %101 }
  0xfc   :  { %v34_v13 = vmul.f32 0.6931472, %v102_v12 }
  0xfe   :  { %v43_v14 = vpop.xlane.xlu1 %42 }
  0xff   :  { %v44_v16 = vsub.f32 %v34_v13, %v43_v14 }
 0x101   :  { %v46_v17 = vmul.f32 %v44_v16, %v25_v15 }
 0x103   :  { %v48_v18 = vsel %vm47_vm1, %v46_v17, 0.0 }
 0x104   :  { %49 = vadd.xlane.f32.xlu2 %v48_v18 }
 0x10c   :  { %63 = vadd.xlane.f32.xlu2 %v62_v19 }
 0x177   :  { %v50_v20 = vpop.xlane.xlu2 %49 }
 0x178   :  { %v51_v21 = vrot.slane %v50_v20, 4 }
 0x17a   :  { %v52_v22 = vadd.f32 %v51_v21, %v50_v20 }
 0x17c   :  { %v53_v23 = vrot.slane %v52_v22, 2 }
 0x17e   :  { %v54_v24 = vadd.f32 %v53_v23, %v52_v22 }
 0x17f   :  { %v64_v25 = vpop.xlane.xlu2 %63 }
 0x180   :  { %v65_v26 = vrot.slane %v64_v25, 4  ;;  %v55_v27 = vrot.slane %v54_v24, 1 }
 0x182   :  { %v66_v28 = vadd.f32 %v65_v26, %v64_v25  ;;  %v56_v29 = vadd.f32 %v55_v27, %v54_v24 }
 0x184   :  { %v67_v30 = vrot.slane %v66_v28, 2  ;;  %91 = vpush %v56_v29 }
 0x186   :  { %v68_v31 = vadd.f32 %v67_v30, %v66_v28 }
 0x188   :  { %v69_v32 = vrot.slane %v68_v31, 1 }
 0x18a   :  { %v70_v33 = vadd.f32 %v69_v32, %v68_v31 }
 0x18c   :  { %93 = vpush %v70_v33 }
 0x1b5   :  { %s92_s2 = spop %91 }
 0x1b6   :  { %60 = sst [smem:[#allocation2]] %s92_s2 }
 0x1bd   :  { %s94_s19 = spop %93 }
 0x1be   :  { %74 = sst [smem:[#allocation2 + $0x1]] %s94_s19 }
 0x1bf   :  { %83 = dma.smem_to_hbm %s118_s20, 16, %s81_s18, [#allocation3]  }
 0x1c0   :  { %115 = dma.done.wait [#allocation3], 16  }
 0x1c1   :  { %116 = vsyncadd [#allocation3], 4294967280 }
 0x1c2   :  { %88 = sfence }
 0x1c3   :  { %89 = vsyncpa [#allocation3], 1 }

</bundles_post_ra>
